<compile_context>
chip_gen: v5e
topology: v5e:2x2
jax: 0.10.0
libtpu: 0.0.40
codegen_flags: <defaults>
</compile_context>

<pallas_src>
import numpy as np
import jax
import jax.numpy as jnp
from jax import lax
from jax.experimental import pallas as pl
from jax.experimental.pallas import tpu as pltpu

EPS = 1e-5
LANES = 128                    # lane-dense channel / contraction padding
TILE_M = 512                   # rows per grid step (fits v7x 64 MiB VMEM budget)
STAT_ROWS = 8                  # sublane-aligned stats rows per core-split
MATMUL_DTYPE = jnp.bfloat16    # bf16 MXU inputs & bf16 HBM streams; f32 accumulate
VMEM_LIMIT = 64 * 1024 * 1024  # raised scoped-VMEM cap


def _round_up(x, m):
    return (x + m - 1) // m * m


def _compiler_params(semantics):
    return pltpu.CompilerParams(dimension_semantics=semantics,
                                vmem_limit_bytes=VMEM_LIMIT)


def _split_for_stats(steps):
    # Leading "parallel" axis so the matmul sweep can use both v7x TensorCores;
    # harmless (serialized) on 1-TC generations.
    return 2 if (steps >= 2 and steps % 2 == 0) else 1


# ----------------------------- Pallas kernels ------------------------------ #

def _stats_kernel(p_ref, w_ref, y_ref, stats_ref):
    """Sweep 1: y = P@W per tile; emit y (bf16) and accumulate sum / sum_sq."""
    @pl.when(pl.program_id(1) == 0)
    def _init():
        stats_ref[...] = jnp.zeros_like(stats_ref)

    y = jnp.dot(p_ref[...], w_ref[...], preferred_element_type=jnp.float32)
    y_ref[...] = y.astype(y_ref.dtype)
    stats_ref[0:1, :] += jnp.sum(y, axis=0, keepdims=True)
    stats_ref[1:2, :] += jnp.sum(y * y, axis=0, keepdims=True)


def _stats_fused_kernel(p_ref, w_ref, x_ref, wsc_ref, y_ref, ysc_ref, stats_ref):
    """Sweep 1 (final stage): res conv + fused 1x1 shortcut conv, both emitted."""
    @pl.when(pl.program_id(1) == 0)
    def _init():
        stats_ref[...] = jnp.zeros_like(stats_ref)

    y = jnp.dot(p_ref[...], w_ref[...], preferred_element_type=jnp.float32)
    ysc = jnp.dot(x_ref[...], wsc_ref[...], preferred_element_type=jnp.float32)
    y_ref[...] = y.astype(y_ref.dtype)
    ysc_ref[...] = ysc.astype(ysc_ref.dtype)
    stats_ref[0:1, :] += jnp.sum(y, axis=0, keepdims=True)
    stats_ref[1:2, :] += jnp.sum(y * y, axis=0, keepdims=True)
    stats_ref[2:3, :] += jnp.sum(ysc, axis=0, keepdims=True)
    stats_ref[3:4, :] += jnp.sum(ysc * ysc, axis=0, keepdims=True)


def _bn_relu_kernel(y_ref, s_ref, t_ref, o_ref):
    """Sweep 2 (inner layers): per-channel affine + ReLU (no matmul)."""
    y = y_ref[...].astype(jnp.float32)
    o_ref[...] = jnp.maximum(y * s_ref[...] + t_ref[...], 0.0).astype(o_ref.dtype)


def _final_proj_kernel(y_ref, ysc_ref, s_ref, t_ref, ssc_ref, tsc_ref, o_ref):
    """Sweep 2 (final, projection shortcut): BN(y) + BN(ysc) -> add -> ReLU."""
    res = y_ref[...].astype(jnp.float32) * s_ref[...] + t_ref[...]
    sc = ysc_ref[...].astype(jnp.float32) * ssc_ref[...] + tsc_ref[...]
    o_ref[...] = jnp.maximum(res + sc, 0.0).astype(o_ref.dtype)


def _final_ident_kernel(y_ref, x_ref, s_ref, t_ref, o_ref):
    """Sweep 2 (final, identity shortcut): BN(y) + x -> ReLU."""
    res = y_ref[...].astype(jnp.float32) * s_ref[...] + t_ref[...]
    o_ref[...] = jnp.maximum(res + x_ref[...].astype(jnp.float32),
                             0.0).astype(o_ref.dtype)


# ----------------------------- pallas_call wrappers ------------------------ #

def _param_spec(cpad):
    return pl.BlockSpec((1, cpad), lambda i: (0, 0))


def _conv_stats(patches, w):
    mp, kdim = patches.shape
    cpad = w.shape[1]
    steps = mp // TILE_M
    nsplit = _split_for_stats(steps)
    sub = steps // nsplit
    cost = pl.CostEstimate(
        flops=2 * mp * kdim * cpad, transcendentals=0,
        bytes_accessed=2 * mp * kdim + 2 * kdim * cpad + 2 * mp * cpad
        + 4 * STAT_ROWS * nsplit * cpad)
    y, stats = pl.pallas_call(
        _stats_kernel,
        out_shape=(jax.ShapeDtypeStruct((mp, cpad), MATMUL_DTYPE),
                   jax.ShapeDtypeStruct((STAT_ROWS * nsplit, cpad), jnp.float32)),
        grid=(nsplit, sub),
        in_specs=[pl.BlockSpec((TILE_M, kdim), lambda c, i: (c * sub + i, 0)),
                  pl.BlockSpec((kdim, cpad), lambda c, i: (0, 0))],
        out_specs=(pl.BlockSpec((TILE_M, cpad), lambda c, i: (c * sub + i, 0)),
                   pl.BlockSpec((STAT_ROWS, cpad), lambda c, i: (c, 0))),
        compiler_params=_compiler_params(("parallel", "arbitrary")),
        cost_estimate=cost,
    )(patches, w)
    stats = stats.reshape(nsplit, STAT_ROWS, cpad).sum(axis=0)
    return y, stats


def _conv_stats_fused(patches, w, x_flat, wsc):
    mp, kdim = patches.shape
    cpad = w.shape[1]
    cin = x_flat.shape[1]
    steps = mp // TILE_M
    nsplit = _split_for_stats(steps)
    sub = steps // nsplit
    cost = pl.CostEstimate(
        flops=2 * mp * (kdim + cin) * cpad, transcendentals=0,
        bytes_accessed=2 * mp * (kdim + cin) + 2 * (kdim + cin) * cpad
        + 4 * mp * cpad + 4 * STAT_ROWS * nsplit * cpad)
    y, ysc, stats = pl.pallas_call(
        _stats_fused_kernel,
        out_shape=(jax.ShapeDtypeStruct((mp, cpad), MATMUL_DTYPE),
                   jax.ShapeDtypeStruct((mp, cpad), MATMUL_DTYPE),
                   jax.ShapeDtypeStruct((STAT_ROWS * nsplit, cpad), jnp.float32)),
        grid=(nsplit, sub),
        in_specs=[pl.BlockSpec((TILE_M, kdim), lambda c, i: (c * sub + i, 0)),
                  pl.BlockSpec((kdim, cpad), lambda c, i: (0, 0)),
                  pl.BlockSpec((TILE_M, cin), lambda c, i: (c * sub + i, 0)),
                  pl.BlockSpec((cin, cpad), lambda c, i: (0, 0))],
        out_specs=(pl.BlockSpec((TILE_M, cpad), lambda c, i: (c * sub + i, 0)),
                   pl.BlockSpec((TILE_M, cpad), lambda c, i: (c * sub + i, 0)),
                   pl.BlockSpec((STAT_ROWS, cpad), lambda c, i: (c, 0))),
        compiler_params=_compiler_params(("parallel", "arbitrary")),
        cost_estimate=cost,
    )(patches, w, x_flat, wsc)
    stats = stats.reshape(nsplit, STAT_ROWS, cpad).sum(axis=0)
    return y, ysc, stats


def _bn_relu_apply(y, scale, shift):
    mp, cpad = y.shape
    return pl.pallas_call(
        _bn_relu_kernel,
        out_shape=jax.ShapeDtypeStruct((mp, cpad), MATMUL_DTYPE),
        grid=(mp // TILE_M,),
        in_specs=[pl.BlockSpec((TILE_M, cpad), lambda i: (i, 0)),
                  _param_spec(cpad), _param_spec(cpad)],
        out_specs=pl.BlockSpec((TILE_M, cpad), lambda i: (i, 0)),
        compiler_params=_compiler_params(("parallel",)),
        cost_estimate=pl.CostEstimate(flops=3 * mp * cpad, transcendentals=0,
                                      bytes_accessed=4 * mp * cpad),
    )(y, scale, shift)


def _final_proj_apply(y, ysc, s_r, t_r, s_s, t_s):
    mp, cpad = y.shape
    return pl.pallas_call(
        _final_proj_kernel,
        out_shape=jax.ShapeDtypeStruct((mp, cpad), MATMUL_DTYPE),
        grid=(mp // TILE_M,),
        in_specs=[pl.BlockSpec((TILE_M, cpad), lambda i: (i, 0)),
                  pl.BlockSpec((TILE_M, cpad), lambda i: (i, 0)),
                  _param_spec(cpad), _param_spec(cpad),
                  _param_spec(cpad), _param_spec(cpad)],
        out_specs=pl.BlockSpec((TILE_M, cpad), lambda i: (i, 0)),
        compiler_params=_compiler_params(("parallel",)),
        cost_estimate=pl.CostEstimate(flops=7 * mp * cpad, transcendentals=0,
                                      bytes_accessed=6 * mp * cpad),
    )(y, ysc, s_r, t_r, s_s, t_s)


def _final_ident_apply(y, x_pad, s_r, t_r):
    mp, cpad = y.shape
    return pl.pallas_call(
        _final_ident_kernel,
        out_shape=jax.ShapeDtypeStruct((mp, cpad), MATMUL_DTYPE),
        grid=(mp // TILE_M,),
        in_specs=[pl.BlockSpec((TILE_M, cpad), lambda i: (i, 0)),
                  pl.BlockSpec((TILE_M, cpad), lambda i: (i, 0)),
                  _param_spec(cpad), _param_spec(cpad)],
        out_specs=pl.BlockSpec((TILE_M, cpad), lambda i: (i, 0)),
        compiler_params=_compiler_params(("parallel",)),
        cost_estimate=pl.CostEstimate(flops=4 * mp * cpad, transcendentals=0,
                                      bytes_accessed=6 * mp * cpad),
    )(y, x_pad, s_r, t_r)


# ----------------------------- plain-JAX glue ------------------------------ #

def _im2col(x_nhwc, kh, kw, ph, pw):
    """'same'-style patch extraction (stride 1). Returns (N*H*W, kh*kw*C)."""
    n, h, w, c = x_nhwc.shape
    xp = jnp.pad(x_nhwc, ((0, 0), (ph, ph), (pw, pw), (0, 0)))
    cols = [xp[:, dh:dh + h, dw:dw + w, :] for dh in range(kh) for dw in range(kw)]
    return jnp.concatenate(cols, axis=-1).reshape(n * h * w, kh * kw * c)


def _pad_cols(a, width):
    return jnp.pad(a, ((0, 0), (0, width - a.shape[1])))


def _prep_weight(wgt, act_ch, kpad, cpad):
    """Pad cin to the (lane-padded) activation width, K to kpad, cout to cpad."""
    kh, kw, cin, cout = wgt.shape
    w = jnp.pad(wgt, ((0, 0), (0, 0), (0, act_ch - cin), (0, 0)))
    w = w.reshape(kh * kw * act_ch, cout)
    w = jnp.pad(w, ((0, kpad - w.shape[0]), (0, cpad - cout)))
    return w.astype(MATMUL_DTYPE)


def _bn_scale_shift(s_sum, s_sq, gamma, beta, m_real):
    """Per-channel (scale, shift) from accumulated sum / sum_sq (done once)."""
    mean = s_sum / m_real
    var = jnp.maximum(s_sq / m_real - mean * mean, 0.0)
    scale = gamma * lax.rsqrt(var + EPS)
    shift = beta - mean * scale
    return scale, shift


def basic_block_forward(x_nchw, res_params, sc_params):
    """res_params: list of (w[kh,kw,cin,cout], bias, gamma, beta, ksize).
       sc_params : (w[1,1,cin,cout], bias, gamma, beta) or None (identity)."""
    n_b, c_in, h, w_sp = x_nchw.shape
    x_nhwc = jnp.transpose(x_nchw, (0, 2, 3, 1))          # -> NHWC
    m = n_b * h * w_sp
    mp = _round_up(m, TILE_M)

    def pad_rows(a):
        # zero rows contribute 0 to sum / sum_sq, so stats divided by real m
        # stay exact; padded output rows are sliced away at the end.
        return jnp.pad(a, ((0, mp - m), (0, 0)))

    def layer_inputs(act, act_ch, wgt, cout):
        k = wgt.shape[0]
        cpad = _round_up(cout, LANES)
        patches = _im2col(act, k, k, k // 2, k // 2)      # (m, k*k*act_ch)
        kpad = _round_up(patches.shape[1], LANES)         # 128-aligned contraction
        patches = pad_rows(_pad_cols(patches, kpad)).astype(MATMUL_DTYPE)
        w2 = _prep_weight(wgt, act_ch, kpad, cpad)
        return patches, w2, cpad

    act, act_ch = x_nhwc, c_in
    n_layers = len(res_params)

    # inner layers: conv -> BN -> ReLU
    for idx in range(n_layers - 1):
        wgt, _bias, g, be, _k = res_params[idx]
        cout = wgt.shape[3]
        patches, w2, cpad = layer_inputs(act, act_ch, wgt, cout)
        y, stats = _conv_stats(patches, w2)
        scale, shift = _bn_scale_shift(
            stats[0:1], stats[1:2],
            _pad_cols(g.reshape(1, cout), cpad),
            _pad_cols(be.reshape(1, cout), cpad), m)
        act_flat = _bn_relu_apply(y, scale, shift)        # bf16
        # keep activations at the lane-dense padded width (no [:, :cout] slice)
        act = act_flat[:m].reshape(n_b, h, w_sp, cpad)
        act_ch = cpad

    # final layer: conv -> BN, fused with shortcut, residual add, ReLU
    wgt, _bias, g, be, _k = res_params[-1]
    cout = wgt.shape[3]
    patches, w2, cpad = layer_inputs(act, act_ch, wgt, cout)
    g2 = _pad_cols(g.reshape(1, cout), cpad)
    be2 = _pad_cols(be.reshape(1, cout), cpad)

    if sc_params is not None:
        wsc, _bsc, gsc, besc = sc_params
        x_flat = pad_rows(x_nhwc.reshape(m, c_in)).astype(MATMUL_DTYPE)
        wsc2 = _pad_cols(wsc.reshape(c_in, cout), cpad).astype(MATMUL_DTYPE)
        y, ysc, stats = _conv_stats_fused(patches, w2, x_flat, wsc2)
        s_r, t_r = _bn_scale_shift(stats[0:1], stats[1:2], g2, be2, m)
        s_s, t_s = _bn_scale_shift(
            stats[2:3], stats[3:4],
            _pad_cols(gsc.reshape(1, cout), cpad),
            _pad_cols(besc.reshape(1, cout), cpad), m)
        out_flat = _final_proj_apply(y, ysc, s_r, t_r, s_s, t_s)
    else:
        # identity shortcut (c_in == cout); bf16 read halves the x HBM stream
        x_pad = pad_rows(_pad_cols(x_nhwc.reshape(m, c_in), cpad)).astype(MATMUL_DTYPE)
        y, stats = _conv_stats(patches, w2)
        s_r, t_r = _bn_scale_shift(stats[0:1], stats[1:2], g2, be2, m)
        out_flat = _final_ident_apply(y, x_pad, s_r, t_r)

    out = out_flat[:m, :cout].reshape(n_b, h, w_sp, cout)
    # kernel HBM write is bf16 (halved); cast back to f32 to match the module.
    return jnp.transpose(out, (0, 3, 1, 2)).astype(jnp.float32)


# ----------------------------- pure-JAX f32 reference ----------------------- #

def _ref_conv_bn(x, w, b, g, be, pad, relu):
    y = lax.conv_general_dilated(
        x, w, window_strides=(1, 1), padding=[(pad, pad), (pad, pad)],
        dimension_numbers=('NCHW', 'HWIO', 'NCHW'),
        precision=lax.Precision.HIGHEST)
    y = y + b[None, :, None, None]          # bias kept here (cancelled by BN)
    mean = jnp.mean(y, axis=(0, 2, 3), keepdims=True)
    var = jnp.mean(jnp.square(y - mean), axis=(0, 2, 3), keepdims=True)
    y = (y - mean) * lax.rsqrt(var + EPS) * g[None, :, None, None] + be[None, :, None, None]
    return jnp.maximum(y, 0.0) if relu else y


def ref_basic_block(x, res_params, sc_params):
    y = x
    n = len(res_params)
    for idx, (w, b, g, be, k) in enumerate(res_params):
        y = _ref_conv_bn(y, w, b, g, be, k // 2, relu=(idx < n - 1))
    if sc_params is not None:
        wsc, bsc, gsc, besc = sc_params
        x = _ref_conv_bn(x, wsc, bsc, gsc, besc, 0, relu=False)
    return jnp.maximum(y + x, 0.0)


# ----------------------------- main ----------------------------------------- #

def _make_params(key, c_in, filters, ksizes):
    keys = jax.random.split(key, len(filters) + 1)
    res_params = []
    cprev = c_in
    for i, (cout, k) in enumerate(zip(filters, ksizes)):
        k1, k2, k3, k4 = jax.random.split(keys[i], 4)
        bound = 1.0 / np.sqrt(cprev * k * k)
        wgt = jax.random.uniform(k1, (k, k, cprev, cout), jnp.float32, -bound, bound)
        bias = jax.random.uniform(k2, (cout,), jnp.float32, -bound, bound)
        gamma = jax.random.uniform(k3, (cout,), jnp.float32, 0.8, 1.2)
        beta = jax.random.uniform(k4, (cout,), jnp.float32, -0.3, 0.3)
        res_params.append((wgt, bias, gamma, beta, k))
        cprev = cout
    sc_params = None
    if c_in != filters[-1]:
        k1, k2, k3, k4 = jax.random.split(keys[-1], 4)
        bound = 1.0 / np.sqrt(c_in)
        wsc = jax.random.uniform(k1, (1, 1, c_in, filters[-1]), jnp.float32, -bound, bound)
        bsc = jax.random.uniform(k2, (filters[-1],), jnp.float32, -bound, bound)
        gsc = jax.random.uniform(k3, (filters[-1],), jnp.float32, 0.8, 1.2)
        besc = jax.random.uniform(k4, (filters[-1],), jnp.float32, -0.3, 0.3)
        sc_params = (wsc, bsc, gsc, besc)
    return res_params, sc_params


def _run_case(key, n, c_in, h, w, filters, ksizes):
    kx, kp = jax.random.split(key)
    x = jax.random.normal(kx, (n, c_in, h, w), jnp.float32)
    res_params, sc_params = _make_params(kp, c_in, filters, ksizes)
    out = jax.block_until_ready(basic_block_forward(x, res_params, sc_params))
    ref = ref_basic_block(x, res_params, sc_params)
    assert out.shape == ref.shape, (out.shape, ref.shape)
    # tolerance reflects bf16 MXU inputs / bf16 streamed activations vs f32 ref
    np.testing.assert_allclose(np.asarray(out), np.asarray(ref), atol=5e-2, rtol=5e-2)


if __name__ == "__main__":
    root = jax.random.PRNGKey(0)
    k1, k2, k3 = jax.random.split(root, 3)
    # projection shortcut (Cin != filters[-1]); M = 512 -> single grid step
    _run_case(k1, 2, 4, 16, 16, [8, 8], [3, 3])
    # projection shortcut, M = 1024 -> multi-tile grid + split stats sweep
    _run_case(k2, 4, 4, 16, 16, [8, 8], [3, 3])
    # identity shortcut (Cin == filters[-1])
    _run_case(k3, 2, 8, 16, 16, [8, 8], [3, 3])
    # TODO(synk): the registered forward hook only prints the output shape; omitted.
    print("KERNEL_OK")
</pallas_src>

<mosaic_0001>
module attributes {stable_mosaic.version = 11 : i64} {
  func.func @_stats_kernel(%arg0: i32, %arg1: i32, %arg2: memref<512x128xbf16, #tpu.memory_space<vmem>>, %arg3: memref<128x128xbf16, #tpu.memory_space<vmem>>, %arg4: memref<512x128xbf16, #tpu.memory_space<vmem>>, %arg5: memref<8x128xf32, #tpu.memory_space<vmem>>) attributes {dimension_semantics = [#tpu.dimension_semantics<parallel>, #tpu.dimension_semantics<arbitrary>], iteration_bounds = array<i64: 1, 1>, scalar_prefetch = 0 : i64, scratch_operands = 0 : i64, tpu.core_type = #tpu.core_type<tc>, window_params = [{transform_indices = @transform_0, window_bounds = array<i64: 512, 128>}, {pipeline_mode = #tpu.pipeline_mode<synchronous>, transform_indices = @transform_1, window_bounds = array<i64: 128, 128>}, {transform_indices = @transform_2, window_bounds = array<i64: 512, 128>}, {transform_indices = @transform_3, window_bounds = array<i64: 8, 128>}]} {
    %c0_i32 = arith.constant 0 : i32
    %0 = arith.cmpi eq, %arg1, %c0_i32 : i32
    %1 = arith.extui %0 : i1 to i32
    %c0_i32_0 = arith.constant 0 : i32
    %2 = arith.cmpi ne, %1, %c0_i32_0 : i32
    scf.if %2 {
      %cst_15 = arith.constant 0.000000e+00 : f32
      %19 = vector.broadcast %cst_15 : f32 to vector<8x128xf32>
      %c0_16 = arith.constant 0 : index
      %c0_17 = arith.constant 0 : index
      %20 = vector.load %arg5[%c0_16, %c0_17] : memref<8x128xf32, #tpu.memory_space<vmem>>, vector<8x128xf32>
      tpu.vector_store %arg5[%c0_16, %c0_17], %19 {strides = array<i32>} : memref<8x128xf32, #tpu.memory_space<vmem>>, vector<8x128xf32>,
    } else {
    }
    %c0 = arith.constant 0 : index
    %c0_1 = arith.constant 0 : index
    %3 = vector.load %arg2[%c0, %c0_1] : memref<512x128xbf16, #tpu.memory_space<vmem>>, vector<512x128xbf16>
    %c0_2 = arith.constant 0 : index
    %c0_3 = arith.constant 0 : index
    %4 = vector.load %arg3[%c0_2, %c0_3] : memref<128x128xbf16, #tpu.memory_space<vmem>>, vector<128x128xbf16>
    %cst = arith.constant dense<0.000000e+00> : vector<512x128xf32>
    %5 = tpu.matmul %3, %4, %cst {dimension_numbers = #tpu.dot_dimension_numbers<[1], [0], [0], [1], [0, 0, 1, 1], [], []>} : vector<512x128xbf16>, vector<128x128xbf16>, vector<512x128xf32> -> vector<512x128xf32>
    %6 = arith.truncf %5 : vector<512x128xf32> to vector<512x128xbf16>
    %c0_4 = arith.constant 0 : index
    %c0_5 = arith.constant 0 : index
    %7 = vector.load %arg4[%c0_4, %c0_5] : memref<512x128xbf16, #tpu.memory_space<vmem>>, vector<512x128xbf16>
    tpu.vector_store %arg4[%c0_4, %c0_5], %6 {strides = array<i32>} : memref<512x128xbf16, #tpu.memory_space<vmem>>, vector<512x128xbf16>,
    %c0_6 = arith.constant 0 : index
    %c0_7 = arith.constant 0 : index
    %8 = vector.load %arg5[%c0_6, %c0_7] : memref<8x128xf32, #tpu.memory_space<vmem>>, vector<1x128xf32>
    %cst_8 = arith.constant dense<0.000000e+00> : vector<128xf32>
    %9 = vector.multi_reduction <add>, %5, %cst_8 [0] : vector<512x128xf32> to vector<128xf32>
    %10 = vector.shape_cast %9 : vector<128xf32> to vector<1x128xf32>
    %11 = arith.addf %8, %10 : vector<1x128xf32>
    %c0_9 = arith.constant 0 : index
    %c0_10 = arith.constant 0 : index
    %12 = vector.load %arg5[%c0_9, %c0_10] : memref<8x128xf32, #tpu.memory_space<vmem>>, vector<1x128xf32>
    tpu.vector_store %arg5[%c0_9, %c0_10], %11 {strides = array<i32>} : memref<8x128xf32, #tpu.memory_space<vmem>>, vector<1x128xf32>,
    %c1 = arith.constant 1 : index
    %c0_11 = arith.constant 0 : index
    %13 = vector.load %arg5[%c1, %c0_11] : memref<8x128xf32, #tpu.memory_space<vmem>>, vector<1x128xf32>
    %14 = arith.mulf %5, %5 : vector<512x128xf32>
    %cst_12 = arith.constant dense<0.000000e+00> : vector<128xf32>
    %15 = vector.multi_reduction <add>, %14, %cst_12 [0] : vector<512x128xf32> to vector<128xf32>
    %16 = vector.shape_cast %15 : vector<128xf32> to vector<1x128xf32>
    %17 = arith.addf %13, %16 : vector<1x128xf32>
    %c1_13 = arith.constant 1 : index
    %c0_14 = arith.constant 0 : index
    %18 = vector.load %arg5[%c1_13, %c0_14] : memref<8x128xf32, #tpu.memory_space<vmem>>, vector<1x128xf32>
    tpu.vector_store %arg5[%c1_13, %c0_14], %17 {strides = array<i32>} : memref<8x128xf32, #tpu.memory_space<vmem>>, vector<1x128xf32>,
    return
  }
  func.func @transform_0(%arg0: i32, %arg1: i32) -> (i32, i32) {
    %c1_i32 = arith.constant 1 : i32
    %0 = arith.muli %arg0, %c1_i32 : i32
    %1 = arith.addi %0, %arg1 : i32
    %c0_i32 = arith.constant 0 : i32
    %c0_i32_0 = arith.constant 0 : i32
    return %1, %c0_i32 : i32, i32
  }
  func.func @transform_1(%arg0: i32, %arg1: i32) -> (i32, i32) {
    %c0_i32 = arith.constant 0 : i32
    %c0_i32_0 = arith.constant 0 : i32
    %c0_i32_1 = arith.constant 0 : i32
    return %c0_i32, %c0_i32_0 : i32, i32
  }
  func.func @transform_2(%arg0: i32, %arg1: i32) -> (i32, i32) {
    %c1_i32 = arith.constant 1 : i32
    %0 = arith.muli %arg0, %c1_i32 : i32
    %1 = arith.addi %0, %arg1 : i32
    %c0_i32 = arith.constant 0 : i32
    %c0_i32_0 = arith.constant 0 : i32
    return %1, %c0_i32 : i32, i32
  }
  func.func @transform_3(%arg0: i32, %arg1: i32) -> (i32, i32) {
    %c0_i32 = arith.constant 0 : i32
    %c0_i32_0 = arith.constant 0 : i32
    return %arg0, %c0_i32 : i32, i32
  }
}

</mosaic_0001>

<bundles_post_ra>
// kernel: tpu_custom_call.1
= control target key start
LH: loop header
LB: loop body
LE: loop exit
PB: predicated region body
PF: predicated region fallthrough
CT: control target
= control target key end

     0   :  { %9 = vsyncpa [#allocation3], 0  ;;  %s1793_s0 = inlined_call_operand.hbm [shape: bf16[512,128], index: 0, kind: input, shape index: {}]   ;;  %s1794_s1 = inlined_call_operand.hbm [shape: bf16[128,128], index: 1, kind: input, shape index: {}]   ;;  %s1795_s2 = inlined_call_operand.hbm [shape: bf16[512,128], index: 2, kind: output, shape index: {0}]   ;;  %s1796_s3 = inlined_call_operand.hbm [shape: f32[8,128], index: 3, kind: output, shape index: {1}]  }
   0x1   :  { %10 = vsyncpa [#allocation6], 0 }
   0x2   :  { %11 = vsyncpa [#allocation4], 0 }
   0x3   :  { %12 = vsyncpa [#allocation9], 0  ;;  %s21_s14 = sshll.u32 %s1793_s0, 4  ;;  %s1451_s15 = smov [#allocation2]   ;;  %s22_s14 = int_to_ptr.hbm [resolvable:$true] %s21_s14 }
   0x4   :  { %s23_s16 = sshll.u32 %s1451_s15, 4  ;;  %s34_s19 = sshll.u32 %s1794_s1, 4  ;;  %s24_s16 = int_to_ptr.vmem [resolvable:$true] %s23_s16  ;;  %s35_s19 = int_to_ptr.hbm [resolvable:$true] %s34_s19 }
   0x5   :  { %s1452_s20 = smov 64   ;;  %s1453_s21 = smov 4  }
   0x6   :  { %29 = dma.hbm_to_vmem [thread:$0]  %s22_s14, 4096, %s24_s16, [#allocation3], %s1452_s20, %s1452_s20, %s1453_s21  }
   0x7   :  { %s1454_s22 = smov [#allocation5]  }
   0x8   :  { %s36_s23 = sshll.u32 %s1454_s22, 4  ;;  %s37_s23 = int_to_ptr.vmem [resolvable:$true] %s36_s23 }
   0x9   :  { %42 = dma.hbm_to_vmem [thread:$0]  %s35_s19, 1024, %s37_s23, [#allocation6], %s1452_s20, %s1452_s20, %s1453_s21  }
   0xa   :  { %1443 = dma.done.wait [#allocation3], 4096  }
   0xb   :  { %1444 = vsyncadd [#allocation3], 4294963200 }
   0xc   :  { %1445 = dma.done.wait [#allocation6], 1024  }
   0xd   :  { %1446 = vsyncadd [#allocation6], 4294966272  ;;  %v1124_v0 = vld [vmem:[#allocation5 + $0x38] sm:$0xff]  ;;  %v1123_v1 = vld [vmem:[#allocation5 + $0x30] sm:$0xff]  ;;  %s1455_s0 = smov [#allocation7]   ;;  %s895_s26 = sshll.u32 %s1795_s2, 4  ;;  %s896_s26 = int_to_ptr.hbm [resolvable:$true] %s895_s26 }
   0xe   :  { %380 = vmatpush.bf16.msra.mxu0 %v1124_v0  ;;  %1316 = vmatpush.bf16.msra.mxu1 %v1124_v0  ;;  %v1122_v2 = vld [vmem:[#allocation5 + $0x28] sm:$0xff]  ;;  %v1121_v3 = vld [vmem:[#allocation5 + $0x20] sm:$0xff]  ;;  %v1120_v4 = vld [vmem:[#allocation5 + $0x18] sm:$0xff]  ;;  %s893_s1 = sshll.u32 %s1455_s0, 4  ;;  %s1457_s2 = smov [#allocation8]   ;;  %s894_s1 = int_to_ptr.vmem [resolvable:$true] %s893_s1 }
   0xf   :  { %1317 = vmatpush.bf16.msra.mxu2 %v1124_v0  ;;  %1318 = vmatpush.bf16.msra.mxu3 %v1124_v0  ;;  %v1119_v5 = vld [vmem:[#allocation5 + $0x10] sm:$0xff]  ;;  %v1118_v6 = vld [vmem:[#allocation5 + $0x8] sm:$0xff]  ;;  %v1117_v7 = vld [vmem:[#allocation5] sm:$0xff]  ;;  %s907_s27 = sshll.u32 %s1457_s2, 4  ;;  %s909_s30 = sshll.u32 %s1796_s3, 4  ;;  %s908_s27 = int_to_ptr.vmem [resolvable:$true] %s907_s27  ;;  %s910_s30 = int_to_ptr.hbm [resolvable:$true] %s909_s30 }
  0x10   :  { %v1085_v8 = vld [vmem:[#allocation2] sm:$0xff]  ;;  %v1086_v10 = vld [vmem:[#allocation2 + $0x8] sm:$0xff]  ;;  %v1087_v13 = vld [vmem:[#allocation2 + $0x10] sm:$0xff] }
  0x11   :  { %v1093_v9 = vld [vmem:[#allocation2 + $0x40] sm:$0xff]  ;;  %v1094_v11 = vld [vmem:[#allocation2 + $0x48] sm:$0xff]  ;;  %v1095_v14 = vld [vmem:[#allocation2 + $0x50] sm:$0xff] }
  0x12   :  { %381 = vmatpush.bf16.msra.mxu0 %v1123_v1  ;;  %1319 = vmatpush.bf16.msra.mxu1 %v1123_v1  ;;  %v1101_v12 = vld [vmem:[#allocation2 + $0x80] sm:$0xff]  ;;  %v1102_v15 = vld [vmem:[#allocation2 + $0x88] sm:$0xff]  ;;  %v1088_v16 = vld [vmem:[#allocation2 + $0x18] sm:$0xff] }
  0x13   :  { %1320 = vmatpush.bf16.msra.mxu2 %v1123_v1  ;;  %1321 = vmatpush.bf16.msra.mxu3 %v1123_v1  ;;  %v1096_v17 = vld [vmem:[#allocation2 + $0x58] sm:$0xff]  ;;  %v1103_v18 = vld [vmem:[#allocation2 + $0x90] sm:$0xff]  ;;  %v1109_v19 = vld [vmem:[#allocation2 + $0xc0] sm:$0xff] }
  0x14   :  { %v1089_v20 = vld [vmem:[#allocation2 + $0x20] sm:$0xff]  ;;  %v1104_v22 = vld [vmem:[#allocation2 + $0x98] sm:$0xff]  ;;  %v1110_v23 = vld [vmem:[#allocation2 + $0xc8] sm:$0xff] }
  0x15   :  { %v1097_v21 = vld [vmem:[#allocation2 + $0x60] sm:$0xff]  ;;  %v1090_v24 = vld [vmem:[#allocation2 + $0x28] sm:$0xff]  ;;  %v1111_v27 = vld [vmem:[#allocation2 + $0xd0] sm:$0xff] }
  0x16   :  { %382 = vmatpush.bf16.msra.mxu0 %v1122_v2  ;;  %1322 = vmatpush.bf16.msra.mxu1 %v1122_v2  ;;  %v1098_v25 = vld [vmem:[#allocation2 + $0x68] sm:$0xff]  ;;  %v1105_v26 = vld [vmem:[#allocation2 + $0xa0] sm:$0xff]  ;;  %v1091_v28 = vld [vmem:[#allocation2 + $0x30] sm:$0xff] }
  0x17   :  { %1323 = vmatpush.bf16.msra.mxu2 %v1122_v2  ;;  %1324 = vmatpush.bf16.msra.mxu3 %v1122_v2  ;;  %v1099_v29 = vld [vmem:[#allocation2 + $0x70] sm:$0xff]  ;;  %v1106_v30 = vld [vmem:[#allocation2 + $0xa8] sm:$0xff]  ;;  %v1112_v31 = vld [vmem:[#allocation2 + $0xd8] sm:$0xff] }
  0x18   :  { %v1092_v32 = vld [vmem:[#allocation2 + $0x38] sm:$0xff]  ;;  %v1107_v34 = vld [vmem:[#allocation2 + $0xb0] sm:$0xff]  ;;  %v1113_v35 = vld [vmem:[#allocation2 + $0xe0] sm:$0xff] }
  0x19   :  { %v1100_v33 = vld [vmem:[#allocation2 + $0x78] sm:$0xff]  ;;  %v1114_v39 = vld [vmem:[#allocation2 + $0xe8] sm:$0xff]  ;;  %v1115_v53 = vld [vmem:[#allocation2 + $0xf0] sm:$0xff] }
  0x1a   :  { %383 = vmatpush.bf16.msra.mxu0 %v1121_v3  ;;  %1325 = vmatpush.bf16.msra.mxu1 %v1121_v3  ;;  %v1108_v38 = vld [vmem:[#allocation2 + $0xb8] sm:$0xff] }
  0x1b   :  { %1326 = vmatpush.bf16.msra.mxu2 %v1121_v3  ;;  %1327 = vmatpush.bf16.msra.mxu3 %v1121_v3 }
  0x1e   :  { %384 = vmatpush.bf16.msra.mxu0 %v1120_v4  ;;  %1328 = vmatpush.bf16.msra.mxu1 %v1120_v4 }
  0x1f   :  { %1329 = vmatpush.bf16.msra.mxu2 %v1120_v4  ;;  %1330 = vmatpush.bf16.msra.mxu3 %v1120_v4 }
  0x22   :  { %385 = vmatpush.bf16.msra.mxu0 %v1119_v5  ;;  %1331 = vmatpush.bf16.msra.mxu1 %v1119_v5 }
  0x23   :  { %1332 = vmatpush.bf16.msra.mxu2 %v1119_v5  ;;  %1333 = vmatpush.bf16.msra.mxu3 %v1119_v5  ;;  %v1116_v5 = vld [vmem:[#allocation2 + $0xf8] sm:$0xff] }
  0x26   :  { %386 = vmatpush.bf16.msra.mxu0 %v1118_v6  ;;  %1334 = vmatpush.bf16.msra.mxu1 %v1118_v6 }
  0x27   :  { %1335 = vmatpush.bf16.msra.mxu2 %v1118_v6  ;;  %1336 = vmatpush.bf16.msra.mxu3 %v1118_v6 }
  0x2a   :  { %387 = vmatpush.bf16.msra.mxu0 %v1117_v7  ;;  %1337 = vmatpush.bf16.msra.mxu1 %v1117_v7 }
  0x2b   :  { %1338 = vmatpush.bf16.msra.mxu2 %v1117_v7  ;;  %1339 = vmatpush.bf16.msra.mxu3 %v1117_v7 }
  0x2d   :  { %388 = vmatmul.bf16.vlgmr.msra.gmra.mxu0 %v1085_v8  ;;  %428 = vmatmul.bf16.vlgmr.msra.gmra.mxu1 %v1093_v9 }
  0x2e   :  { %468 = vmatmul.bf16.vlgmr.msra.gmra.mxu2 %v1101_v12  ;;  %508 = vmatmul.bf16.vlgmr.msra.gmra.mxu3 %v1109_v19 }
  0x3d   :  { %393 = vmatmul.bf16.gmra.mxu0 %v1086_v10  ;;  %433 = vmatmul.bf16.gmra.mxu1 %v1094_v11 }
  0x3e   :  { %473 = vmatmul.bf16.gmra.mxu2 %v1102_v15  ;;  %513 = vmatmul.bf16.gmra.mxu3 %v1110_v23 }
  0x4d   :  { %398 = vmatmul.bf16.gmra.mxu0 %v1087_v13  ;;  %438 = vmatmul.bf16.gmra.mxu1 %v1095_v14 }
  0x4e   :  { %478 = vmatmul.bf16.gmra.mxu2 %v1103_v18  ;;  %518 = vmatmul.bf16.gmra.mxu3 %v1111_v27 }
  0x5d   :  { %403 = vmatmul.bf16.gmra.mxu0 %v1088_v16  ;;  %443 = vmatmul.bf16.gmra.mxu1 %v1096_v17 }
  0x5e   :  { %483 = vmatmul.bf16.gmra.mxu2 %v1104_v22  ;;  %523 = vmatmul.bf16.gmra.mxu3 %v1112_v31 }
  0x6d   :  { %408 = vmatmul.bf16.gmra.mxu0 %v1089_v20  ;;  %448 = vmatmul.bf16.gmra.mxu1 %v1097_v21 }
  0x6e   :  { %488 = vmatmul.bf16.gmra.mxu2 %v1105_v26  ;;  %528 = vmatmul.bf16.gmra.mxu3 %v1113_v35 }
  0x7d   :  { %413 = vmatmul.bf16.gmra.mxu0 %v1090_v24  ;;  %453 = vmatmul.bf16.gmra.mxu1 %v1098_v25 }
  0x7e   :  { %493 = vmatmul.bf16.gmra.mxu2 %v1106_v30  ;;  %533 = vmatmul.bf16.gmra.mxu3 %v1114_v39 }
  0x8d   :  { %418 = vmatmul.bf16.gmra.mxu0 %v1091_v28  ;;  %458 = vmatmul.bf16.gmra.mxu1 %v1099_v29 }
  0x8e   :  { %498 = vmatmul.bf16.gmra.mxu2 %v1107_v34  ;;  %538 = vmatmul.bf16.gmra.mxu3 %v1115_v53 }
  0x9d   :  { %423 = vmatmul.bf16.gmra.mxu0 %v1092_v32  ;;  %463 = vmatmul.bf16.gmra.mxu1 %v1100_v33 }
  0x9e   :  { %503 = vmatmul.bf16.gmra.mxu2 %v1108_v38  ;;  %543 = vmatmul.bf16.gmra.mxu3 %v1116_v5 }
  0xaa   :  { %v389_v36 = vpop.f32.mrf.mxu0  ;;  %v1490_v37 = vpop.f32.mrf.mxu1 }
  0xab   :  { %v750_v40 = vmul.f32 %v389_v36, %v389_v36 }
  0xb1   :  { %v1502_v60 = vpop.f32.mrf.mxu2  ;;  %v1532_v20 = vpop.f32.mrf.mxu3 }
  0xb2   :  { %v391_v41 = vpop.f32.mrf.mxu0  ;;  %v1492_v42 = vpop.f32.mrf.mxu1 }
  0xb3   :  { %v1128_v43 = vpack.c.bf16 %v391_v41, %v389_v36  ;;  %v678_v44 = vadd.f32 %v391_v41, %v389_v36  ;;  %v751_v45 = vmul.f32 %v391_v41, %v391_v41  ;;  %v1168_v46 = vpack.c.bf16 %v1492_v42, %v1490_v37 }
  0xb5   :  { %1129 = vst [vmem:[#allocation7] sm:$0xff] %v1128_v43   ;;  %v814_v47 = vadd.f32 %v751_v45, %v750_v40 }
  0xb6   :  { %1292 = vst [vmem:[#allocation7 + $0x40] sm:$0xff] %v1168_v46  }
  0xb9   :  { %v1508_v2 = vpop.f32.mrf.mxu2  ;;  %v1538_v24 = vpop.f32.mrf.mxu3 }
  0xba   :  { %v394_v48 = vpop.f32.mrf.mxu0  ;;  %v1496_v49 = vpop.f32.mrf.mxu1  ;;  %v1208_v3 = vpack.c.bf16 %v1508_v2, %v1502_v60  ;;  %v1248_v26 = vpack.c.bf16 %v1538_v24, %v1532_v20 }
  0xbb   :  { %v679_v50 = vadd.f32 %v678_v44, %v394_v48  ;;  %v752_v51 = vmul.f32 %v394_v48, %v394_v48 }
  0xbc   :  { %1300 = vst [vmem:[#allocation7 + $0x80] sm:$0xff] %v1208_v3  }
  0xbd   :  { %v815_v52 = vadd.f32 %v814_v47, %v752_v51  ;;  %1308 = vst [vmem:[#allocation7 + $0xc0] sm:$0xff] %v1248_v26  }
  0xc1   :  { %v1518_v10 = vpop.f32.mrf.mxu2  ;;  %v1550_v32 = vpop.f32.mrf.mxu3 }
  0xc2   :  { %v396_v54 = vpop.f32.mrf.mxu0  ;;  %v1498_v55 = vpop.f32.mrf.mxu1 }
  0xc3   :  { %v1133_v56 = vpack.c.bf16 %v396_v54, %v394_v48  ;;  %v680_v57 = vadd.f32 %v679_v50, %v396_v54  ;;  %v753_v58 = vmul.f32 %v396_v54, %v396_v54  ;;  %v1173_v59 = vpack.c.bf16 %v1498_v55, %v1496_v49 }
  0xc5   :  { %1285 = vst [vmem:[#allocation7 + $0x8] sm:$0xff] %v1133_v56   ;;  %v816_v61 = vadd.f32 %v815_v52, %v753_v58 }
  0xc6   :  { %1293 = vst [vmem:[#allocation7 + $0x48] sm:$0xff] %v1173_v59  }
  0xc9   :  { %v1522_v13 = vpop.f32.mrf.mxu2  ;;  %v1556_v36 = vpop.f32.mrf.mxu3 }
  0xca   :  { %v399_v62 = vpop.f32.mrf.mxu0  ;;  %v1504_v63 = vpop.f32.mrf.mxu1  ;;  %v1213_v14 = vpack.c.bf16 %v1522_v13, %v1518_v10  ;;  %v1253_v39 = vpack.c.bf16 %v1556_v36, %v1550_v32 }
  0xcb   :  { %v1506_v0 = vadd.f32 %v680_v57, %v399_v62  ;;  %v754_v1 = vmul.f32 %v399_v62, %v399_v62 }
  0xcc   :  { %1301 = vst [vmem:[#allocation7 + $0x88] sm:$0xff] %v1213_v14  }
  0xcd   :  { %v1512_v4 = vadd.f32 %v816_v61, %v754_v1  ;;  %1309 = vst [vmem:[#allocation7 + $0xc8] sm:$0xff] %v1253_v39  }
  0xd1   :  { %v1530_v19 = vpop.f32.mrf.mxu2  ;;  %v1568_v46 = vpop.f32.mrf.mxu3 }
  0xd2   :  { %v401_v6 = vpop.f32.mrf.mxu0  ;;  %v1514_v7 = vpop.f32.mrf.mxu1 }
  0xd3   :  { %v1138_v8 = vpack.c.bf16 %v401_v6, %v399_v62  ;;  %v1178_v9 = vpack.c.bf16 %v1514_v7, %v1504_v63  ;;  %v755_v52 = vmul.f32 %v401_v6, %v401_v6  ;;  %v682_v57 = vadd.f32 %v1506_v0, %v401_v6 }
  0xd5   :  { %1286 = vst [vmem:[#allocation7 + $0x10] sm:$0xff] %v1138_v8   ;;  %v818_v58 = vadd.f32 %v1512_v4, %v755_v52 }
  0xd6   :  { %1294 = vst [vmem:[#allocation7 + $0x50] sm:$0xff] %v1178_v9  }
  0xd9   :  { %v1536_v23 = vpop.f32.mrf.mxu2  ;;  %v1574_v51 = vpop.f32.mrf.mxu3 }
  0xda   :  { %v404_v11 = vpop.f32.mrf.mxu0  ;;  %v1520_v12 = vpop.f32.mrf.mxu1  ;;  %v1218_v25 = vpack.c.bf16 %v1536_v23, %v1530_v19  ;;  %v1258_v54 = vpack.c.bf16 %v1574_v51, %v1568_v46 }
  0xdb   :  { %v756_v56 = vmul.f32 %v404_v11, %v404_v11  ;;  %v683_v61 = vadd.f32 %v682_v57, %v404_v11 }
  0xdc   :  { %1302 = vst [vmem:[#allocation7 + $0x90] sm:$0xff] %v1218_v25  }
  0xdd   :  { %1310 = vst [vmem:[#allocation7 + $0xd0] sm:$0xff] %v1258_v54   ;;  %v819_v62 = vadd.f32 %v818_v58, %v756_v56 }
  0xe1   :  { %v1548_v31 = vpop.f32.mrf.mxu2 }
  0xe2   :  { %v406_v15 = vpop.f32.mrf.mxu0  ;;  %v1526_v16 = vpop.f32.mrf.mxu1 }
  0xe3   :  { %v1143_v17 = vpack.c.bf16 %v406_v15, %v404_v11  ;;  %v1183_v18 = vpack.c.bf16 %v1526_v16, %v1520_v12  ;;  %v757_v59 = vmul.f32 %v406_v15, %v406_v15  ;;  %v684_v8 = vadd.f32 %v683_v61, %v406_v15 }
  0xe5   :  { %1287 = vst [vmem:[#allocation7 + $0x18] sm:$0xff] %v1143_v17   ;;  %v820_v0 = vadd.f32 %v819_v62, %v757_v59 }
  0xe6   :  { %1295 = vst [vmem:[#allocation7 + $0x58] sm:$0xff] %v1183_v18   ;;  %v1588_v18 = vpop.f32.mrf.mxu3 }
  0xe9   :  { %v1554_v35 = vpop.f32.mrf.mxu2 }
  0xea   :  { %v409_v21 = vpop.f32.mrf.mxu0  ;;  %v1534_v22 = vpop.f32.mrf.mxu1  ;;  %v1223_v38 = vpack.c.bf16 %v1554_v35, %v1548_v31 }
  0xeb   :  { %v758_v1 = vmul.f32 %v409_v21, %v409_v21  ;;  %v685_v25 = vadd.f32 %v684_v8, %v409_v21 }
  0xec   :  { %1303 = vst [vmem:[#allocation7 + $0x98] sm:$0xff] %v1223_v38  }
  0xed   :  { %v821_v4 = vadd.f32 %v820_v0, %v758_v1 }
  0xee   :  { %v1594_v54 = vpop.f32.mrf.mxu3 }
  0xf1   :  { %v1566_v45 = vpop.f32.mrf.mxu2 }
  0xf2   :  { %v411_v27 = vpop.f32.mrf.mxu0  ;;  %v1544_v28 = vpop.f32.mrf.mxu1 }
  0xf3   :  { %v1148_v29 = vpack.c.bf16 %v411_v27, %v409_v21  ;;  %v1188_v30 = vpack.c.bf16 %v1544_v28, %v1534_v22  ;;  %v759_v6 = vmul.f32 %v411_v27, %v411_v27  ;;  %v686_v26 = vadd.f32 %v685_v25, %v411_v27 }
  0xf4   :  { %v1263_v27 = vpack.c.bf16 %v1594_v54, %v1588_v18 }
  0xf5   :  { %1288 = vst [vmem:[#allocation7 + $0x20] sm:$0xff] %v1148_v29   ;;  %v822_v29 = vadd.f32 %v821_v4, %v759_v6 }
  0xf6   :  { %1296 = vst [vmem:[#allocation7 + $0x60] sm:$0xff] %v1188_v30  }
  0xf7   :  { %1311 = vst [vmem:[#allocation7 + $0xd8] sm:$0xff] %v1263_v27  }
  0xf9   :  { %v1572_v50 = vpop.f32.mrf.mxu2 }
  0xfa   :  { %v414_v33 = vpop.f32.mrf.mxu0  ;;  %v1552_v34 = vpop.f32.mrf.mxu1  ;;  %v1228_v53 = vpack.c.bf16 %v1572_v50, %v1566_v45 }
  0xfb   :  { %v760_v11 = vmul.f32 %v414_v33, %v414_v33  ;;  %v687_v38 = vadd.f32 %v686_v26, %v414_v33 }
  0xfc   :  { %1304 = vst [vmem:[#allocation7 + $0xa0] sm:$0xff] %v1228_v53  }
  0xfd   :  { %v823_v15 = vadd.f32 %v822_v29, %v760_v11  ;;  %v767_v29 = vmul.f32 %v1492_v42, %v1492_v42 }
 0x101   :  { %v1586_v17 = vpop.f32.mrf.mxu2 }
 0x102   :  { %v416_v40 = vpop.f32.mrf.mxu0  ;;  %v1562_v41 = vpop.f32.mrf.mxu1 }
 0x103   :  { %v1153_v43 = vpack.c.bf16 %v416_v40, %v414_v33  ;;  %v1193_v44 = vpack.c.bf16 %v1562_v41, %v1552_v34  ;;  %v761_v30 = vmul.f32 %v416_v40, %v416_v40  ;;  %v688_v52 = vadd.f32 %v687_v38, %v416_v40 }
 0x105   :  { %1289 = vst [vmem:[#allocation7 + $0x28] sm:$0xff] %v1153_v43   ;;  %v824_v56 = vadd.f32 %v823_v15, %v761_v30  ;;  %v768_v15 = vmul.f32 %v1496_v49, %v1496_v49 }
 0x106   :  { %1297 = vst [vmem:[#allocation7 + $0x68] sm:$0xff] %v1193_v44  }
 0x109   :  { %v1592_v53 = vpop.f32.mrf.mxu2 }
 0x10a   :  { %v419_v47 = vpop.f32.mrf.mxu0  ;;  %v1570_v48 = vpop.f32.mrf.mxu1  ;;  %v1233_v57 = vpack.c.bf16 %v1592_v53, %v1586_v17 }
 0x10b   :  { %v762_v39 = vmul.f32 %v419_v47, %v419_v47  ;;  %v689_v58 = vadd.f32 %v688_v52, %v419_v47  ;;  %v769_v52 = vmul.f32 %v1498_v55, %v1498_v55 }
 0x10c   :  { %1305 = vst [vmem:[#allocation7 + $0xa8] sm:$0xff] %v1233_v57  }
 0x10d   :  { %v825_v33 = vadd.f32 %v824_v56, %v762_v39 }
 0x111   :  { %v1604_v4 = vpop.f32.mrf.mxu2 }
 0x112   :  { %v421_v3 = vpop.f32.mrf.mxu0  ;;  %v1582_v5 = vpop.f32.mrf.mxu1 }
 0x113   :  { %v1158_v9 = vpack.c.bf16 %v421_v3, %v419_v47  ;;  %v1198_v14 = vpack.c.bf16 %v1582_v5, %v1570_v48  ;;  %v763_v21 = vmul.f32 %v421_v3, %v421_v3  ;;  %v690_v61 = vadd.f32 %v689_v58, %v421_v3  ;;  %v1606_v47 = vpop.f32.mrf.mxu3 }
 0x114   :  { %v766_v3 = vmul.f32 %v1490_v37, %v1490_v37 }
 0x115   :  { %1290 = vst [vmem:[#allocation7 + $0x30] sm:$0xff] %v1158_v9   ;;  %v826_v62 = vadd.f32 %v825_v33, %v763_v21 }
 0x116   :  { %1298 = vst [vmem:[#allocation7 + $0x70] sm:$0xff] %v1198_v14  }
 0x119   :  { %v1620_v21 = vpop.f32.mrf.mxu2 }
 0x11a   :  { %v424_v43 = vpop.f32.mrf.mxu0  ;;  %v1590_v44 = vpop.f32.mrf.mxu1 }
 0x11b   :  { %v764_v59 = vmul.f32 %v424_v43, %v424_v43  ;;  %v691_v40 = vadd.f32 %v690_v61, %v424_v43  ;;  %v1622_v57 = vpop.f32.mrf.mxu3 }
 0x11c   :  { %v1268_v27 = vpack.c.bf16 %v1622_v57, %v1606_v47 }
 0x11d   :  { %v827_v1 = vadd.f32 %v826_v62, %v764_v59  ;;  %v772_v62 = vmul.f32 %v1520_v12, %v1520_v12 }
 0x11e   :  { %1312 = vst [vmem:[#allocation7 + $0xe0] sm:$0xff] %v1268_v27   ;;  %v779_v27 = vmul.f32 %v1582_v5, %v1582_v5 }
 0x122   :  { %v426_v8 = vpop.f32.mrf.mxu0  ;;  %v1600_v9 = vpop.f32.mrf.mxu1 }
 0x123   :  { %v1163_v14 = vpack.c.bf16 %v426_v8, %v424_v43  ;;  %v692_v0 = vadd.f32 %v691_v40, %v426_v8  ;;  %v765_v6 = vmul.f32 %v426_v8, %v426_v8  ;;  %v1203_v25 = vpack.c.bf16 %v1600_v9, %v1590_v44 }
 0x124   :  { %v773_v8 = vmul.f32 %v1526_v16, %v1526_v16 }
 0x125   :  { %1291 = vst [vmem:[#allocation7 + $0x38] sm:$0xff] %v1163_v14   ;;  %v693_v11 = vadd.f32 %v692_v0, %v1490_v37  ;;  %v828_v26 = vadd.f32 %v827_v1, %v765_v6  ;;  %v1640_v0 = vpop.f32.mrf.mxu2  ;;  %v1642_v6 = vpop.f32.mrf.mxu3 }
 0x126   :  { %1299 = vst [vmem:[#allocation7 + $0x78] sm:$0xff] %v1203_v25  }
 0x127   :  { %v694_v30 = vadd.f32 %v693_v11, %v1492_v42  ;;  %v829_v38 = vadd.f32 %v828_v26, %v766_v3  ;;  %v1238_v42 = vpack.c.bf16 %v1620_v21, %v1604_v4  ;;  %v775_v11 = vmul.f32 %v1544_v28, %v1544_v28 }
 0x129   :  { %v695_v39 = vadd.f32 %v694_v30, %v1496_v49  ;;  %v830_v43 = vadd.f32 %v829_v38, %v767_v29  ;;  %v770_v49 = vmul.f32 %v1504_v63, %v1504_v63  ;;  %1306 = vst [vmem:[#allocation7 + $0xb0] sm:$0xff] %v1238_v42   ;;  %v777_v38 = vmul.f32 %v1562_v41, %v1562_v41 }
 0x12b   :  { %v696_v56 = vadd.f32 %v695_v39, %v1498_v55  ;;  %v831_v37 = vadd.f32 %v830_v43, %v768_v15  ;;  %v771_v55 = vmul.f32 %v1514_v7, %v1514_v7 }
 0x12d   :  { %v697_v58 = vadd.f32 %v696_v56, %v1504_v63  ;;  %v832_v33 = vadd.f32 %v831_v37, %v769_v52  ;;  %v1658_v43 = vpop.f32.mrf.mxu3 }
 0x12e   :  { %v1273_v52 = vpack.c.bf16 %v1658_v43, %v1642_v6 }
 0x12f   :  { %v698_v59 = vadd.f32 %v697_v58, %v1514_v7  ;;  %v833_v61 = vadd.f32 %v832_v33, %v770_v49  ;;  %v774_v7 = vmul.f32 %v1534_v22, %v1534_v22  ;;  %v780_v33 = vmul.f32 %v1590_v44, %v1590_v44 }
 0x130   :  { %1313 = vst [vmem:[#allocation7 + $0xe8] sm:$0xff] %v1273_v52   ;;  %v790_v52 = vmul.f32 %v1566_v45, %v1566_v45 }
 0x131   :  { %v834_v40 = vadd.f32 %v833_v61, %v771_v55  ;;  %v699_v1 = vadd.f32 %v698_v59, %v1520_v12 }
 0x133   :  { %v700_v63 = vadd.f32 %v699_v1, %v1526_v16  ;;  %v835_v14 = vadd.f32 %v834_v40, %v772_v62  ;;  %v776_v16 = vmul.f32 %v1552_v34, %v1552_v34  ;;  %v782_v62 = vmul.f32 %v1502_v60, %v1502_v60 }
 0x134   :  { %v783_v1 = vmul.f32 %v1508_v2, %v1508_v2 }
 0x135   :  { %v701_v25 = vadd.f32 %v700_v63, %v1534_v22  ;;  %v836_v3 = vadd.f32 %v835_v14, %v773_v8  ;;  %v1656_v22 = vpop.f32.mrf.mxu2  ;;  %v1676_v61 = vpop.f32.mrf.mxu3  ;;  %v784_v63 = vmul.f32 %v1518_v10, %v1518_v10 }
 0x137   :  { %v702_v12 = vadd.f32 %v701_v25, %v1544_v28  ;;  %v837_v26 = vadd.f32 %v836_v3, %v774_v7  ;;  %v1243_v28 = vpack.c.bf16 %v1656_v22, %v1640_v0  ;;  %v785_v7 = vmul.f32 %v1522_v13, %v1522_v13 }
 0x139   :  { %v703_v29 = vadd.f32 %v702_v12, %v1552_v34  ;;  %v838_v30 = vadd.f32 %v837_v26, %v775_v11  ;;  %v778_v34 = vmul.f32 %v1570_v48, %v1570_v48  ;;  %1307 = vst [vmem:[#allocation7 + $0xb8] sm:$0xff] %v1243_v28  }
 0x13b   :  { %v704_v15 = vadd.f32 %v703_v29, %v1562_v41  ;;  %v839_v39 = vadd.f32 %v838_v30, %v776_v16 }
 0x13d   :  { %v705_v56 = vadd.f32 %v704_v15, %v1570_v48  ;;  %v840_v37 = vadd.f32 %v839_v39, %v777_v38  ;;  %v781_v48 = vmul.f32 %v1600_v9, %v1600_v9  ;;  %v789_v15 = vmul.f32 %v1554_v35, %v1554_v35 }
 0x13f   :  { %v841_v42 = vadd.f32 %v840_v37, %v778_v34  ;;  %v706_v41 = vadd.f32 %v705_v56, %v1582_v5  ;;  %v791_v34 = vmul.f32 %v1572_v50, %v1572_v50 }
 0x141   :  { %v842_v49 = vadd.f32 %v841_v42, %v779_v27  ;;  %v707_v58 = vadd.f32 %v706_v41, %v1590_v44  ;;  %v792_v42 = vmul.f32 %v1586_v17, %v1586_v17  ;;  %v793_v27 = vmul.f32 %v1592_v53, %v1592_v53 }
 0x143   :  { %v843_v55 = vadd.f32 %v842_v49, %v780_v33  ;;  %v708_v59 = vadd.f32 %v707_v58, %v1600_v9 }
 0x145   :  { %v709_v5 = vadd.f32 %v708_v59, %v1502_v60  ;;  %v844_v40 = vadd.f32 %v843_v55, %v781_v48  ;;  %v1690_v60 = vpop.f32.mrf.mxu3  ;;  %v794_v55 = vmul.f32 %v1604_v4, %v1604_v4 }
 0x146   :  { %v1278_v11 = vpack.c.bf16 %v1690_v60, %v1676_v61 }
 0x147   :  { %v710_v8 = vadd.f32 %v709_v5, %v1508_v2  ;;  %v845_v44 = vadd.f32 %v844_v40, %v782_v62  ;;  %v786_v2 = vmul.f32 %v1530_v19, %v1530_v19  ;;  %v796_v40 = vmul.f32 %v1640_v0, %v1640_v0 }
 0x148   :  { %1314 = vst [vmem:[#allocation7 + $0xf0] sm:$0xff] %v1278_v11   ;;  %v1456_v11 = vmov 0.0  }
 0x149   :  { %v711_v14 = vadd.f32 %v710_v8, %v1518_v10  ;;  %v846_v9 = vadd.f32 %v845_v44, %v783_v1  ;;  %v787_v10 = vmul.f32 %v1536_v23, %v1536_v23  ;;  %v797_v8 = vmul.f32 %v1656_v22, %v1656_v22  ;;  %59 = vst [vmem:[#allocation8] sm:$0xff] %v1456_v11 }
 0x14a   :  { %v798_v44 = vmul.f32 %v1532_v20, %v1532_v20 }
 0x14b   :  { %v712_v25 = vadd.f32 %v711_v14, %v1522_v13  ;;  %v847_v3 = vadd.f32 %v846_v9, %v784_v63  ;;  %v788_v13 = vmul.f32 %v1548_v31, %v1548_v31  ;;  %v799_v14 = vmul.f32 %v1538_v24, %v1538_v24 }
 0x14d   :  { %v713_v12 = vadd.f32 %v712_v25, %v1530_v19  ;;  %v848_v26 = vadd.f32 %v847_v3, %v785_v7  ;;  %v1706_v28 = vpop.f32.mrf.mxu3 }
 0x14f   :  { %v714_v16 = vadd.f32 %v713_v12, %v1536_v23  ;;  %v849_v29 = vadd.f32 %v848_v26, %v786_v2  ;;  %v802_v12 = vmul.f32 %v1568_v46, %v1568_v46 }
 0x151   :  { %v850_v30 = vadd.f32 %v849_v29, %v787_v10  ;;  %v715_v38 = vadd.f32 %v714_v16, %v1548_v31  ;;  %v803_v10 = vmul.f32 %v1574_v51, %v1574_v51  ;;  %v804_v29 = vmul.f32 %v1588_v18, %v1588_v18 }
 0x153   :  { %v716_v39 = vadd.f32 %v715_v38, %v1554_v35  ;;  %v851_v19 = vadd.f32 %v850_v30, %v788_v13 }
 0x155   :  { %v717_v23 = vadd.f32 %v716_v39, %v1566_v45  ;;  %v852_v56 = vadd.f32 %v851_v19, %v789_v15 }
 0x157   :  { %v718_v37 = vadd.f32 %v717_v23, %v1572_v50  ;;  %v853_v31 = vadd.f32 %v852_v56, %v790_v52  ;;  %v1723_v50 = vpop.f32.mrf.mxu3 }
 0x158   :  { %v1283_v58 = vpack.c.bf16 %v1723_v50, %v1706_v28 }
 0x159   :  { %v719_v35 = vadd.f32 %v718_v37, %v1586_v17  ;;  %v854_v41 = vadd.f32 %v853_v31, %v791_v34  ;;  %v809_v37 = vmul.f32 %v1658_v43, %v1658_v43 }
 0x15a   :  { %1315 = vst [vmem:[#allocation7 + $0xf8] sm:$0xff] %v1283_v58  }
 0x15b   :  { %v720_v45 = vadd.f32 %v719_v35, %v1592_v53  ;;  %v855_v49 = vadd.f32 %v854_v41, %v792_v42  ;;  %v795_v53 = vmul.f32 %v1620_v21, %v1620_v21  ;;  %901 = dma.vmem_to_hbm [thread:$0]  %s894_s1, 4096, %s896_s26, [#allocation4], %s1452_s20, %s1452_s20, %s1453_s21   ;;  %v810_v35 = vmul.f32 %v1676_v61, %v1676_v61 }
 0x15d   :  { %v856_v17 = vadd.f32 %v855_v49, %v793_v27  ;;  %v721_v33 = vadd.f32 %v720_v45, %v1604_v4  ;;  %v811_v45 = vmul.f32 %v1690_v60, %v1690_v60  ;;  %v812_v49 = vmul.f32 %v1706_v28, %v1706_v28 }
 0x15f   :  { %v857_v59 = vadd.f32 %v856_v17, %v794_v55  ;;  %v722_v48 = vadd.f32 %v721_v33, %v1620_v21  ;;  %v813_v17 = vmul.f32 %v1723_v50, %v1723_v50 }
 0x161   :  { %v858_v62 = vadd.f32 %v857_v59, %v795_v53  ;;  %v723_v5 = vadd.f32 %v722_v48, %v1640_v0  ;;  %v800_v0 = vmul.f32 %v1550_v32, %v1550_v32 }
 0x163   :  { %v859_v1 = vadd.f32 %v858_v62, %v796_v40  ;;  %v724_v4 = vadd.f32 %v723_v5, %v1656_v22  ;;  %v801_v22 = vmul.f32 %v1556_v36, %v1556_v36 }
 0x165   :  { %v725_v21 = vadd.f32 %v724_v4, %v1532_v20  ;;  %v860_v63 = vadd.f32 %v859_v1, %v797_v8  ;;  %v677_v1 = vld [vmem:[#allocation8] sm:$0x1] }
 0x167   :  { %v726_v9 = vadd.f32 %v725_v21, %v1538_v24  ;;  %v861_v7 = vadd.f32 %v860_v63, %v798_v44 }
 0x169   :  { %v727_v25 = vadd.f32 %v726_v9, %v1550_v32  ;;  %v862_v3 = vadd.f32 %v861_v7, %v799_v14 }
 0x16b   :  { %v728_v20 = vadd.f32 %v727_v25, %v1556_v36  ;;  %v863_v2 = vadd.f32 %v862_v3, %v800_v0  ;;  %v805_v36 = vmul.f32 %v1594_v54, %v1594_v54 }
 0x16d   :  { %v729_v24 = vadd.f32 %v728_v20, %v1568_v46  ;;  %v864_v26 = vadd.f32 %v863_v2, %v801_v22  ;;  %v806_v46 = vmul.f32 %v1606_v47, %v1606_v47 }
 0x16f   :  { %v730_v32 = vadd.f32 %v729_v24, %v1574_v51  ;;  %v865_v16 = vadd.f32 %v864_v26, %v802_v12  ;;  %v807_v51 = vmul.f32 %v1622_v57, %v1622_v57 }
 0x171   :  { %v866_v13 = vadd.f32 %v865_v16, %v803_v10  ;;  %v731_v30 = vadd.f32 %v730_v32, %v1588_v18  ;;  %v808_v18 = vmul.f32 %v1642_v6, %v1642_v6 }
 0x173   :  { %v732_v38 = vadd.f32 %v731_v30, %v1594_v54  ;;  %v867_v15 = vadd.f32 %v866_v13, %v804_v29 }
 0x175   :  { %v733_v39 = vadd.f32 %v732_v38, %v1606_v47  ;;  %v868_v19 = vadd.f32 %v867_v15, %v805_v36 }
 0x177   :  { %v734_v52 = vadd.f32 %v733_v39, %v1622_v57  ;;  %v869_v23 = vadd.f32 %v868_v19, %v806_v46 }
 0x179   :  { %v735_v56 = vadd.f32 %v734_v52, %v1642_v6  ;;  %v870_v34 = vadd.f32 %v869_v23, %v807_v51 }
 0x17b   :  { %v736_v54 = vadd.f32 %v735_v56, %v1658_v43  ;;  %v871_v31 = vadd.f32 %v870_v34, %v808_v18 }
 0x17d   :  { %v872_v47 = vadd.f32 %v871_v31, %v809_v37  ;;  %v737_v42 = vadd.f32 %v736_v54, %v1676_v61 }
 0x17f   :  { %v873_v57 = vadd.f32 %v872_v47, %v810_v35  ;;  %v738_v41 = vadd.f32 %v737_v42, %v1690_v60 }
 0x181   :  { %v874_v6 = vadd.f32 %v873_v57, %v811_v45  ;;  %v739_v27 = vadd.f32 %v738_v41, %v1706_v28  ;;  %v749_v28 = vld [vmem:[#allocation8 + $0x1] sm:$0x1] }
 0x183   :  { %v875_v43 = vadd.f32 %v874_v6, %v812_v49  ;;  %v740_v58 = vadd.f32 %v739_v27, %v1723_v50 }
 0x185   :  { %v741_v33 = vrot.slane %v740_v58, 4  ;;  %v876_v61 = vadd.f32 %v875_v43, %v813_v17 }
 0x187   :  { %v742_v55 = vadd.f32 %v741_v33, %v740_v58  ;;  %v877_v59 = vrot.slane %v876_v61, 4 }
 0x189   :  { %v743_v48 = vrot.slane %v742_v55, 2  ;;  %v878_v53 = vadd.f32 %v877_v59, %v876_v61 }
 0x18b   :  { %v744_v62 = vadd.f32 %v743_v48, %v742_v55  ;;  %v879_v60 = vrot.slane %v878_v53, 2 }
 0x18d   :  { %v745_v5 = vrot.slane %v744_v62, 1  ;;  %v880_v40 = vadd.f32 %v879_v60, %v878_v53 }
 0x18f   :  { %v746_v4 = vadd.f32 %v745_v5, %v744_v62  ;;  %v881_v8 = vrot.slane %v880_v40, 1 }
 0x191   :  { %v882_v50 = vadd.f32 %v881_v8, %v880_v40  ;;  %v747_v44 = vadd.f32 %v746_v4, %v677_v1 }
 0x193   :  { %748 = vst [vmem:[#allocation8] sm:$0x1] %v747_v44  ;;  %v883_v21 = vadd.f32 %v882_v50, %v749_v28 }
 0x195   :  { %884 = vst [vmem:[#allocation8 + $0x1] sm:$0x1] %v883_v21 }
 0x196   :  { %912 = dma.vmem_to_hbm [thread:$0]  %s908_s27, 128, %s910_s30, [#allocation9]  }
 0x197   :  { %1447 = dma.done.wait [#allocation4], 4096  }
 0x198   :  { %1448 = vsyncadd [#allocation4], 4294963200 }
 0x199   :  { %1449 = dma.done.wait [#allocation9], 128  }
 0x19a   :  { %1450 = vsyncadd [#allocation9], 4294967168 }
 0x19b   :  { %921 = vsyncpa [#allocation3], 1 }
 0x19c   :  { %922 = vsyncpa [#allocation6], 1 }
 0x19d   :  { %923 = vsyncpa [#allocation4], 1 }
 0x19e   :  { %924 = vsyncpa [#allocation9], 1 }

</bundles_post_ra>
